<compile_context>
chip_gen: v7x
topology: tpu7x:2x2x1
jax: 0.10.0
libtpu: 0.0.40
codegen_flags: <defaults>
</compile_context>

<pallas_src>
import functools

import jax
import jax.numpy as jnp
from jax.experimental import pallas as pl
from jax.experimental.pallas import tpu as pltpu


def _round_up(a, b):
    return (a + b - 1) // b * b


def _moe_kernel(x_ref, comb_ref, w1_ref, b1_ref, w2_ref, b2_ref,
                o_ref, acc_ref):
    """grid = (row_tiles, n_experts); expert axis reduces into acc_ref."""
    e = pl.program_id(1)

    @pl.when(e == 0)
    def _init():
        acc_ref[...] = jnp.zeros_like(acc_ref)

    # ---- expert e: Linear(H->D) -> SiLU -> Linear(D->H), bf16 MXU / f32 acc ----
    x = x_ref[...]                                                  # (tm, H) bf16
    h = jnp.dot(x, w1_ref[e], preferred_element_type=jnp.float32)   # (tm, D) f32
    h = h + b1_ref[e].astype(jnp.float32)
    h = h * jax.nn.sigmoid(h)                                       # SiLU in f32
    y = jnp.dot(h.astype(x.dtype), w2_ref[e],
                preferred_element_type=jnp.float32)                 # (tm, H) f32
    y = y + b2_ref[e].astype(jnp.float32)

    # Per-token routing weight of expert e (precomputed; includes route_scale).
    acc_ref[...] += y * comb_ref[0]                                  # (tm,1) bcast

    @pl.when(e == pl.num_programs(1) - 1)
    def _finalize():
        o_ref[...] = acc_ref[...].astype(o_ref.dtype)


def moe_layer(x, gate_w, w1, b1, w2, b2, *, n_active, route_scale=1.0,
              block_rows=1024):
    """MoE forward.

    x:      (..., H)
    gate_w: (NE, H)     = nn.Linear(H, NE, bias=False).weight
    w1:     (NE, H, D)  = expert[0].weight.T stacked;  b1: (NE, D)
    w2:     (NE, D, H)  = expert[2].weight.T stacked;  b2: (NE, H)
    """
    orig_shape = x.shape
    orig_dtype = x.dtype
    H = orig_shape[-1]
    NE, _, D = w1.shape
    K = int(n_active)

    x2d = x.reshape(-1, H)
    rows = x2d.shape[0]

    # bf16 MXU path for the expert matmuls (f32 accumulation inside the kernel).
    compute_dtype = jnp.bfloat16 if x2d.dtype == jnp.float32 else x2d.dtype
    itemsize = jnp.dtype(compute_dtype).itemsize
    sublane = 8 if itemsize == 4 else (16 if itemsize == 2 else 32)

    # Row tile: large & sublane-aligned, but keep >=2 tiles when rows permit
    # so the "parallel" row axis can shard across v7x's two TensorCores.
    tm = min(block_rows, _round_up(rows, sublane))
    tm = max(sublane, _round_up(tm, sublane))
    if _round_up(rows, tm) // tm < 2 and tm >= 2 * sublane:
        half = _round_up((tm + 1) // 2, sublane)
        if _round_up(rows, half) // half >= 2:
            tm = half
    rows_padded = _round_up(rows, tm)
    if rows_padded != rows:
        x2d = jnp.pad(x2d, ((0, rows_padded - rows), (0, 0)))

    # ---- gating in plain JAX (O(rows*H*NE), negligible) -> dense combine ----
    xg = x2d.astype(jnp.float32)
    logits = jnp.dot(xg, jnp.asarray(gate_w, jnp.float32).T,
                     precision=jax.lax.Precision.HIGHEST)            # (rows, NE)
    probs = jax.nn.softmax(logits, axis=-1)
    topv, topi = jax.lax.top_k(probs, K)
    topv = topv / jnp.sum(topv, axis=-1, keepdims=True)
    onehot = jax.nn.one_hot(topi, NE, dtype=jnp.float32)             # (rows,K,NE)
    combine = jnp.einsum('rk,rke->re', topv, onehot) * float(route_scale)
    comb_t = combine.T.reshape(NE, rows_padded, 1)                   # (NE,rows,1)

    # ---- kernel operands ----
    x_in = x2d.astype(compute_dtype)
    w1c = jnp.asarray(w1, compute_dtype)
    w2c = jnp.asarray(w2, compute_dtype)
    b1r = jnp.asarray(b1, jnp.float32).reshape(NE, 1, D)
    b2r = jnp.asarray(b2, jnp.float32).reshape(NE, 1, H)

    grid = (rows_padded // tm, NE)

    # VMEM footprint (weights resident + double-buffered tiles), capped < v7x 64MiB.
    out_itemsize = jnp.dtype(orig_dtype).itemsize
    weight_bytes = NE * (H * D + D * H) * itemsize + NE * (D + H) * 4
    tile_bytes = (2 * tm * H * itemsize          # x double buffer
                  + 2 * tm * H * out_itemsize    # out double buffer
                  + tm * H * 4                   # f32 accumulator
                  + 2 * NE * tm * 4)             # combine slices
    vmem_limit = int(min(48 * 1024 * 1024,
                         max(16 * 1024 * 1024,
                             2 * weight_bytes + tile_bytes + 8 * 1024 * 1024)))

    cost = pl.CostEstimate(
        flops=int(4 * NE * rows_padded * H * D),
        transcendentals=int(NE * rows_padded * D),
        bytes_accessed=int(rows_padded * H * (itemsize + out_itemsize)
                           + weight_bytes
                           + NE * rows_padded * 4),
    )

    # TODO(synk): for NE >= 8, switch to the scalar-prefetch (group-offset)
    # pattern / pl.when-skip so only selected (tile, expert) pairs are visited;
    # at NE=4, K=2 the dense combine is only a 2x compute overhead.
    out = pl.pallas_call(
        _moe_kernel,
        out_shape=jax.ShapeDtypeStruct((rows_padded, H), orig_dtype),
        grid_spec=pltpu.PrefetchScalarGridSpec(
            num_scalar_prefetch=0,
            grid=grid,
            in_specs=[
                pl.BlockSpec((tm, H), lambda i, e: (i, 0)),          # x row tile
                pl.BlockSpec((1, tm, 1), lambda i, e: (e, i, 0)),    # combine w_e
                pl.BlockSpec((NE, H, D), lambda i, e: (0, 0, 0)),    # W1 resident
                pl.BlockSpec((NE, 1, D), lambda i, e: (0, 0, 0)),    # b1 resident
                pl.BlockSpec((NE, D, H), lambda i, e: (0, 0, 0)),    # W2 resident
                pl.BlockSpec((NE, 1, H), lambda i, e: (0, 0, 0)),    # b2 resident
            ],
            out_specs=pl.BlockSpec((tm, H), lambda i, e: (i, 0)),
            scratch_shapes=[pltpu.VMEM((tm, H), jnp.float32)],       # accumulator
        ),
        compiler_params=pltpu.CompilerParams(
            dimension_semantics=("parallel", "arbitrary"),
            vmem_limit_bytes=vmem_limit,
        ),
        cost_estimate=cost,
    )(x_in, comb_t, w1c, b1r, w2c, b2r)

    return out[:rows].reshape(orig_shape).astype(orig_dtype)


# ----------------------------- pure-JAX reference -----------------------------
def moe_ref(x, gate_w, w1, b1, w2, b2, *, n_active, route_scale=1.0):
    H = x.shape[-1]
    NE = gate_w.shape[0]
    xf = x.reshape(-1, H).astype(jnp.float32)
    logits = jnp.dot(xf, gate_w.astype(jnp.float32).T,
                     precision=jax.lax.Precision.HIGHEST)
    probs = jax.nn.softmax(logits, axis=-1)
    topv, topi = jax.lax.top_k(probs, n_active)
    topv = topv / jnp.sum(topv, axis=-1, keepdims=True)
    out = jnp.zeros_like(xf)
    for k in range(n_active):
        wk = topv[:, k:k + 1]
        idxk = topi[:, k]
        for j in range(NE):
            mask = (idxk == j)[:, None]
            h = jax.nn.silu(jnp.dot(xf, w1[j].astype(jnp.float32),
                                    precision=jax.lax.Precision.HIGHEST)
                            + b1[j].astype(jnp.float32))
            y = jnp.dot(h, w2[j].astype(jnp.float32),
                        precision=jax.lax.Precision.HIGHEST) + b2[j].astype(jnp.float32)
            out = out + jnp.where(mask, y * wk, 0.0)
    return (out * route_scale).astype(x.dtype).reshape(x.shape)


if __name__ == "__main__":
    # VishwamaiConfig defaults: hidden_size=256, intermediate_size=512,
    # n_routed_experts=4, n_activated_experts=2, route_scale=1.0
    batch, seq, H, D, NE, K = 2, 8, 256, 512, 4, 2
    route_scale = 1.0

    key = jax.random.PRNGKey(0)
    ks = jax.random.split(key, 6)
    x = jax.random.normal(ks[0], (batch, seq, H), dtype=jnp.float32)
    gate_w = jax.random.normal(ks[1], (NE, H), dtype=jnp.float32) * 0.05   # (out,in)
    w1 = jax.random.normal(ks[2], (NE, H, D), dtype=jnp.float32) * 0.05    # W1^T
    b1 = jax.random.normal(ks[3], (NE, D), dtype=jnp.float32) * 0.05
    w2 = jax.random.normal(ks[4], (NE, D, H), dtype=jnp.float32) * 0.05    # W2^T
    b2 = jax.random.normal(ks[5], (NE, H), dtype=jnp.float32) * 0.05

    y = moe_layer(x, gate_w, w1, b1, w2, b2, n_active=K, route_scale=route_scale)
    y = jax.block_until_ready(y)

    y_ref = moe_ref(x, gate_w, w1, b1, w2, b2, n_active=K, route_scale=route_scale)

    assert y.shape == x.shape and y.dtype == x.dtype
    # bf16 MXU path (f32 accumulation): allow ~1% relative error vs f32 reference.
    assert jnp.allclose(y, y_ref, atol=5e-2, rtol=5e-2), float(
        jnp.max(jnp.abs(y - y_ref)))
    print("KERNEL_OK")
</pallas_src>

<mosaic_0001>
module attributes {stable_mosaic.version = 11 : i64} {
  func.func @_moe_kernel(%arg0: i32, %arg1: i32, %arg2: memref<16x256xbf16, #tpu.memory_space<vmem>>, %arg3: memref<1x16x1xf32, #tpu.memory_space<vmem>>, %arg4: memref<4x256x512xbf16, #tpu.memory_space<vmem>>, %arg5: memref<4x1x512xf32, #tpu.memory_space<vmem>>, %arg6: memref<4x512x256xbf16, #tpu.memory_space<vmem>>, %arg7: memref<4x1x256xf32, #tpu.memory_space<vmem>>, %arg8: memref<16x256xf32, #tpu.memory_space<vmem>>, %arg9: memref<16x256xf32, #tpu.memory_space<vmem>>) attributes {dimension_semantics = [#tpu.dimension_semantics<parallel>, #tpu.dimension_semantics<arbitrary>], iteration_bounds = array<i64: 1, 4>, scalar_prefetch = 0 : i64, scratch_operands = 1 : i64, tpu.core_type = #tpu.core_type<tc>, window_params = [{transform_indices = @transform_0, window_bounds = array<i64: 16, 256>}, {transform_indices = @transform_1, window_bounds = array<i64: 1, 16, 1>}, {pipeline_mode = #tpu.pipeline_mode<synchronous>, transform_indices = @transform_2, window_bounds = array<i64: 4, 256, 512>}, {pipeline_mode = #tpu.pipeline_mode<synchronous>, transform_indices = @transform_3, window_bounds = array<i64: 4, 1, 512>}, {pipeline_mode = #tpu.pipeline_mode<synchronous>, transform_indices = @transform_4, window_bounds = array<i64: 4, 512, 256>}, {pipeline_mode = #tpu.pipeline_mode<synchronous>, transform_indices = @transform_5, window_bounds = array<i64: 4, 1, 256>}, {transform_indices = @transform_6, window_bounds = array<i64: 16, 256>}]} {
    %c0_i32 = arith.constant 0 : i32
    %0 = arith.cmpi eq, %arg1, %c0_i32 : i32
    %1 = arith.extui %0 : i1 to i32
    %c0_i32_0 = arith.constant 0 : i32
    %2 = arith.cmpi ne, %1, %c0_i32_0 : i32
    scf.if %2 {
      %cst_20 = arith.constant 0.000000e+00 : f32
      %39 = vector.broadcast %cst_20 : f32 to vector<16x256xf32>
      %c0_21 = arith.constant 0 : index
      %c0_22 = arith.constant 0 : index
      %40 = vector.load %arg9[%c0_21, %c0_22] : memref<16x256xf32, #tpu.memory_space<vmem>>, vector<16x256xf32>
      tpu.vector_store %arg9[%c0_21, %c0_22], %39 {strides = array<i32>} : memref<16x256xf32, #tpu.memory_space<vmem>>, vector<16x256xf32>,
    } else {
    }
    %c0 = arith.constant 0 : index
    %c0_1 = arith.constant 0 : index
    %3 = vector.load %arg2[%c0, %c0_1] : memref<16x256xbf16, #tpu.memory_space<vmem>>, vector<16x256xbf16>
    %4 = arith.index_cast %arg1 : i32 to index
    %c0_2 = arith.constant 0 : index
    %c0_3 = arith.constant 0 : index
    %5 = vector.load %arg4[%4, %c0_2, %c0_3] : memref<4x256x512xbf16, #tpu.memory_space<vmem>>, vector<1x256x512xbf16>
    %6 = vector.shape_cast %5 : vector<1x256x512xbf16> to vector<256x512xbf16>
    %cst = arith.constant dense<0.000000e+00> : vector<16x512xf32>
    %7 = tpu.matmul %3, %6, %cst {dimension_numbers = #tpu.dot_dimension_numbers<[1], [0], [0], [1], [0, 0, 1, 1], [], []>} : vector<16x256xbf16>, vector<256x512xbf16>, vector<16x512xf32> -> vector<16x512xf32>
    %8 = arith.index_cast %arg1 : i32 to index
    %c0_4 = arith.constant 0 : index
    %c0_5 = arith.constant 0 : index
    %9 = vector.load %arg5[%8, %c0_4, %c0_5] : memref<4x1x512xf32, #tpu.memory_space<vmem>>, vector<1x1x512xf32>
    %10 = vector.shape_cast %9 : vector<1x1x512xf32> to vector<1x512xf32>
    %11 = vector.broadcast %10 : vector<1x512xf32> to vector<16x512xf32>
    %12 = arith.addf %7, %11 : vector<16x512xf32>
    %13 = arith.negf %12 : vector<16x512xf32>
    %14 = math.exp %13 : vector<16x512xf32>
    %cst_6 = arith.constant 1.000000e+00 : f32
    %15 = vector.broadcast %cst_6 : f32 to vector<16x512xf32>
    %16 = arith.addf %15, %14 : vector<16x512xf32>
    %17 = arith.divf %15, %16 : vector<16x512xf32>
    %18 = arith.mulf %12, %17 : vector<16x512xf32>
    %19 = arith.truncf %18 : vector<16x512xf32> to vector<16x512xbf16>
    %20 = arith.index_cast %arg1 : i32 to index
    %c0_7 = arith.constant 0 : index
    %c0_8 = arith.constant 0 : index
    %21 = vector.load %arg6[%20, %c0_7, %c0_8] : memref<4x512x256xbf16, #tpu.memory_space<vmem>>, vector<1x512x256xbf16>
    %22 = vector.shape_cast %21 : vector<1x512x256xbf16> to vector<512x256xbf16>
    %cst_9 = arith.constant dense<0.000000e+00> : vector<16x256xf32>
    %23 = tpu.matmul %19, %22, %cst_9 {dimension_numbers = #tpu.dot_dimension_numbers<[1], [0], [0], [1], [0, 0, 1, 1], [], []>} : vector<16x512xbf16>, vector<512x256xbf16>, vector<16x256xf32> -> vector<16x256xf32>
    %24 = arith.index_cast %arg1 : i32 to index
    %c0_10 = arith.constant 0 : index
    %c0_11 = arith.constant 0 : index
    %25 = vector.load %arg7[%24, %c0_10, %c0_11] : memref<4x1x256xf32, #tpu.memory_space<vmem>>, vector<1x1x256xf32>
    %26 = vector.shape_cast %25 : vector<1x1x256xf32> to vector<1x256xf32>
    %27 = vector.broadcast %26 : vector<1x256xf32> to vector<16x256xf32>
    %28 = arith.addf %23, %27 : vector<16x256xf32>
    %c0_12 = arith.constant 0 : index
    %c0_13 = arith.constant 0 : index
    %29 = vector.load %arg9[%c0_12, %c0_13] : memref<16x256xf32, #tpu.memory_space<vmem>>, vector<16x256xf32>
    %c0_14 = arith.constant 0 : index
    %c0_15 = arith.constant 0 : index
    %c0_16 = arith.constant 0 : index
    %30 = vector.load %arg3[%c0_14, %c0_15, %c0_16] : memref<1x16x1xf32, #tpu.memory_space<vmem>>, vector<1x16x1xf32>
    %31 = vector.shape_cast %30 : vector<1x16x1xf32> to vector<16x1xf32>
    %32 = vector.broadcast %31 : vector<16x1xf32> to vector<16x256xf32>
    %33 = arith.mulf %28, %32 : vector<16x256xf32>
    %34 = arith.addf %29, %33 : vector<16x256xf32>
    %c0_17 = arith.constant 0 : index
    %c0_18 = arith.constant 0 : index
    %35 = vector.load %arg9[%c0_17, %c0_18] : memref<16x256xf32, #tpu.memory_space<vmem>>, vector<16x256xf32>
    tpu.vector_store %arg9[%c0_17, %c0_18], %34 {strides = array<i32>} : memref<16x256xf32, #tpu.memory_space<vmem>>, vector<16x256xf32>,
    %c3_i32 = arith.constant 3 : i32
    %36 = arith.cmpi eq, %arg1, %c3_i32 : i32
    %37 = arith.extui %36 : i1 to i32
    %c0_i32_19 = arith.constant 0 : i32
    %38 = arith.cmpi ne, %37, %c0_i32_19 : i32
    scf.if %38 {
      %c0_20 = arith.constant 0 : index
      %c0_21 = arith.constant 0 : index
      %39 = vector.load %arg9[%c0_20, %c0_21] : memref<16x256xf32, #tpu.memory_space<vmem>>, vector<16x256xf32>
      %c0_22 = arith.constant 0 : index
      %c0_23 = arith.constant 0 : index
      %40 = vector.load %arg8[%c0_22, %c0_23] : memref<16x256xf32, #tpu.memory_space<vmem>>, vector<16x256xf32>
      tpu.vector_store %arg8[%c0_22, %c0_23], %39 {strides = array<i32>} : memref<16x256xf32, #tpu.memory_space<vmem>>, vector<16x256xf32>,
    } else {
    }
    return
  }
  func.func @transform_0(%arg0: i32, %arg1: i32) -> (i32, i32) {
    %c0_i32 = arith.constant 0 : i32
    %c0_i32_0 = arith.constant 0 : i32
    return %arg0, %c0_i32 : i32, i32
  }
  func.func @transform_1(%arg0: i32, %arg1: i32) -> (i32, i32, i32) {
    %c0_i32 = arith.constant 0 : i32
    %c0_i32_0 = arith.constant 0 : i32
    return %arg1, %arg0, %c0_i32 : i32, i32, i32
  }
  func.func @transform_2(%arg0: i32, %arg1: i32) -> (i32, i32, i32) {
    %c0_i32 = arith.constant 0 : i32
    %c0_i32_0 = arith.constant 0 : i32
    %c0_i32_1 = arith.constant 0 : i32
    %c0_i32_2 = arith.constant 0 : i32
    return %c0_i32, %c0_i32_0, %c0_i32_1 : i32, i32, i32
  }
  func.func @transform_3(%arg0: i32, %arg1: i32) -> (i32, i32, i32) {
    %c0_i32 = arith.constant 0 : i32
    %c0_i32_0 = arith.constant 0 : i32
    %c0_i32_1 = arith.constant 0 : i32
    %c0_i32_2 = arith.constant 0 : i32
    return %c0_i32, %c0_i32_0, %c0_i32_1 : i32, i32, i32
  }
  func.func @transform_4(%arg0: i32, %arg1: i32) -> (i32, i32, i32) {
    %c0_i32 = arith.constant 0 : i32
    %c0_i32_0 = arith.constant 0 : i32
    %c0_i32_1 = arith.constant 0 : i32
    %c0_i32_2 = arith.constant 0 : i32
    return %c0_i32, %c0_i32_0, %c0_i32_1 : i32, i32, i32
  }
  func.func @transform_5(%arg0: i32, %arg1: i32) -> (i32, i32, i32) {
    %c0_i32 = arith.constant 0 : i32
    %c0_i32_0 = arith.constant 0 : i32
    %c0_i32_1 = arith.constant 0 : i32
    %c0_i32_2 = arith.constant 0 : i32
    return %c0_i32, %c0_i32_0, %c0_i32_1 : i32, i32, i32
  }
  func.func @transform_6(%arg0: i32, %arg1: i32) -> (i32, i32) {
    %c0_i32 = arith.constant 0 : i32
    %c0_i32_0 = arith.constant 0 : i32
    return %arg0, %c0_i32 : i32, i32
  }
}

</mosaic_0001>

<bundles_post_ra>
// kernel: tpu_custom_call.1
= control target key start
LH: loop header
LB: loop body
LE: loop exit
PB: predicated region body
PF: predicated region fallthrough
CT: control target
= control target key end

     0   :  { %11 = vsyncpa [#allocation4], 0  ;;  %s2492_s0 = inlined_call_operand.vmem [shape: bf16[16,256], index: 0, kind: input, shape index: {}]   ;;  %s2493_s1 = inlined_call_operand.vmem [shape: f32[4,16,1], index: 1, kind: input, shape index: {}]   ;;  %s2494_s2 = inlined_call_operand.hbm [shape: bf16[4,256,512], index: 2, kind: input, shape index: {}]   ;;  %s2495_s3 = inlined_call_operand.vmem [shape: f32[4,1,512], index: 3, kind: input, shape index: {}]   ;;  %s2496_s4 = inlined_call_operand.hbm [shape: bf16[4,512,256], index: 4, kind: input, shape index: {}]   ;;  %s2497_s5 = inlined_call_operand.vmem [shape: f32[4,1,256], index: 5, kind: input, shape index: {}]   ;;  %s2498_s6 = inlined_call_operand.hbm [shape: f32[16,256], index: 6, kind: output, shape index: {}]  }
   0x1   :  { %12 = vsyncpa [#allocation7], 0 }
   0x2   :  { %13 = vsyncpa [#allocation5], 0  ;;  %s2167_s21 = smov 0   ;;  %s2169_s22 = smov 0  }
   0x3   :  { %s2171_s23 = smov 0  }
   0x4 LB: > { %s1544_s24 = sadd.s32 4294967295, %s2119_s23   ;;  %s28_s25 = sadd.s32 1, %s2115_s22  ;;  %s2119_s23 = sphi %s2171_s23, %s19_s23   ;;  %s2115_s22 = sphi %s2169_s22, %s2509_s22   ;;  %s2111_s21 = sphi %s2167_s21, %s2508_s21  }
   0x5   : > { %p29_p0 = scmp.ge.s32.totalorder %s28_s25, 4  ;;  %p1545_p1 = scmp.ge.s32.totalorder %s2119_s23, 1 }
   0x6   : > { %p200_p2 = scmp.lt.s32.totalorder %s2119_s23, 5  ;;  %p2194_p4 = scmp.eq.s32.totalorder %s1544_s24, 0 }
   0x7   : > { %s2511_s25 = smov (%p29_p0, %s28_s25), 0  ;;  %s2121_s28 = smov [#allocation3]  }
   0x8   : > { %p2188_p3 = pnand %p1545_p1, %p200_p2  ;;  %s222_s29 = sshll.u32 %s2121_s28, 4  ;;  %s223_s29 = int_to_ptr.vmem [resolvable:$true] %s222_s29 }
   0x9   : > { %s2503_s27 = scalar_select %p2194_p4, 1, 0 }
   0xa   : > { %s2502_s26 = scalar_select %p2188_p3, 1, 0 }
   0xb   : > { %p1727_p5 = pneg %p2188_p3  ;;  %s2122_s7 = smov [#allocation6]  }
   0xc   : > { %s238_s8 = sshll.u32 %s2122_s7, 4  ;;  %s2003_s11 = scalar_lea.hbm %s2494_s2, 32768  ;;  %s2206_s8 = int_to_ptr.vmem [resolvable:$true] %s238_s8 }
   0xd   : > { %p2202_p6 = pnand %p2194_p4, %p1727_p5  ;;  %p2004_p7 = scmp.ne.s32.totalorder %s2494_s2, %s2003_s11 }
   0xe   : > { %p2010_p11 = scmp.lt.u32.totalorder %s2003_s11, %s2494_s2 }
   0xf   : > { %p2005_p8 = pneg %p2202_p6 }
  0x11   : > { %p2006_p9 = pnand %p2005_p8, %p2004_p7 }
  0x13   : > { %p2007_p10 = pneg %p2006_p9 }
  0x15   : > { %p2012_p12 = pnand %p2010_p11, %p2007_p10 }
  0x17   : > { %2015 = shalt.err (!%p2012_p12)
}
  0x18   : > { %s2016_s16 = scalar_lea.vmem %s223_s29, 32768  ;;  %p2024_p2 = scmp.lt.s32.totalorder %s223_s29, %s223_s29 }
  0x19   : > { %p2017_p13 = scmp.ne.s32.totalorder %s223_s29, %s2016_s16  ;;  %p2025_p5 = scmp.lt.s32.totalorder %s2016_s16, %s2016_s16 }
  0x1b   : > { %p2019_p0 = pnand %p2017_p13, %p2005_p8  ;;  %p2026_p4 = por %p2025_p5, %p2024_p2 }
  0x1d   : > { %p2020_p1 = pneg %p2019_p0 }
  0x1f   : > { %p2027_p3 = pnand %p2026_p4, %p2020_p1 }
  0x21   : > { %2030 = shalt.err (!%p2027_p3)
}
  0x22   : > { %s2123_s17 = smov 256   ;;  %s2124_s18 = smov 16  }
  0x23   : > { %1730 = dma.hbm_to_vmem [thread:$0]  (!%p2202_p6), %s2494_s2, 32768, %s223_s29, [#allocation4], %s2123_s17, %s2123_s17, %s2124_s18  }
  0x24   : > { %s2031_s9 = scalar_lea.hbm %s2496_s4, 32768 }
  0x25   : > { %p2032_p7 = scmp.ne.s32.totalorder %s2496_s4, %s2031_s9  ;;  %p2038_p9 = scmp.lt.u32.totalorder %s2031_s9, %s2496_s4 }
  0x27   : > { %p2034_p3 = pnand %p2032_p7, %p2005_p8 }
  0x29   : > { %p2035_p4 = pneg %p2034_p3 }
  0x2b   : > { %p2040_p10 = pnand %p2038_p9, %p2035_p4 }
  0x2d   : > { %2043 = shalt.err (!%p2040_p10)
}
  0x2e   : > { %s2044_s29 = scalar_lea.vmem %s2206_s8, 32768  ;;  %p2052_p0 = scmp.lt.s32.totalorder %s2206_s8, %s2206_s8 }
  0x2f   : > { %p2045_p11 = scmp.ne.s32.totalorder %s2206_s8, %s2044_s29  ;;  %p2053_p1 = scmp.lt.s32.totalorder %s2044_s29, %s2044_s29 }
  0x31   : > { %p2047_p12 = pnand %p2045_p11, %p2005_p8  ;;  %p2054_p2 = por %p2053_p1, %p2052_p0 }
  0x33   : > { %p2048_p13 = pneg %p2047_p12 }
  0x35   : > { %p2055_p5 = pnand %p2054_p2, %p2048_p13 }
  0x37   : > { %2058 = shalt.err (!%p2055_p5)
}
  0x38   : > { %s2125_s14 = smov 128   ;;  %s2126_s15 = smov 8  }
  0x39   : > { %1733 = dma.hbm_to_vmem [thread:$0]  (!%p2202_p6), %s2496_s4, 32768, %s2206_s8, [#allocation7], %s2125_s14, %s2125_s14, %s2126_s15  }
  0x3a   : > { %p2505_p7 = scmp.ne.s32.totalorder %s2502_s26, 0 }
  0x3b   : > { %p2506_p8 = scmp.ne.s32.totalorder (!%p2505_p7), %s2503_s27, 0 }
  0x3c   : > { %270 = sbr.rel (%p2505_p7) target bundleno = 715 (0x2cb), region = 44 }
  0x43   : > { %2098 = dma.done.wait (%p2506_p8), [#allocation4], 32768  }
  0x44   : > { %2100 = vsyncadd (%p2506_p8), [#allocation4], 4294934528 }
  0x45   : > { %2102 = dma.done.wait (%p2506_p8), [#allocation7], 32768  }
  0x46   : > { %2104 = vsyncadd (%p2506_p8), [#allocation7], 4294934528  ;;  %p317_p3 = scmp.lt.s32.totalorder %s2111_s21, 3  ;;  %p1555_p6 = scmp.ne.s32.totalorder %s2111_s21, 0 }
  0x47   : > { %v2127_v0 = vmov (!%p1555_p6), 0.0  }
  0x48   : > { %s318_s30 = scalar_select %p317_p3, %s2111_s21, 3 }
  0x49   : > { %330 = sbr.rel (%p1555_p6) target bundleno = 80 (0x50), region = 56  ;;  %331 = vst [vmem:[#allocation2] sm:$0xff] (!%p1555_p6), %v2127_v0  ;;  %332 = vst [vmem:[#allocation2 + $0x8] sm:$0xff] (!%p1555_p6), %v2127_v0 }
  0x4a   : > { %s1704_s8 = sshll.u32 %s318_s30, 4  ;;  %333 = vst [vmem:[#allocation2 + $0x10] sm:$0xff] (!%p1555_p6), %v2127_v0  ;;  %334 = vst [vmem:[#allocation2 + $0x18] sm:$0xff] (!%p1555_p6), %v2127_v0 }
  0x4b   : > { %s2270_s19 = scalar_lea.vmem %s2493_s1, %s1704_s8 }
  0x50 PF: > { %s1705_s27 = sshll.u32 %s2111_s21, 9  ;;  %v2277_v1 = vld [vmem:[%s2492_s0 + $0x4] ss:$8 sps:$4 sm:$0xff]   ;;  %v2335_v46 = vld [vmem:[%s2492_s0] ss:$8 sps:$4 sm:$0xff]   ;;  %s1558_s12 = sshll.u32 %s2111_s21, 2 }
  0x51   : > { %s2281_s7 = scalar_lea.vmem [#allocation3], %s1705_s27  ;;  %790 = vmatprep.mubr.bf16.mxu1 %v2277_v1  ;;  %s2311_s9 = scalar_lea.vmem [#allocation6], %s1705_s27 }
  0x52   : > { %v1776_v2 = vld [vmem:[%s2281_s7 + $0x4] ss:$16 sps:$4 sm:$0xff]   ;;  %v1778_v3 = vld [vmem:[%s2281_s7] ss:$16 sps:$4 sm:$0xff]   ;;  %v1829_v45 = vld [vmem:[%s2281_s7 + $0xc] ss:$16 sps:$4 sm:$0xff]   ;;  %s405_s14 = scalar_lea.vmem %s2495_s3, %s1558_s12 }
  0x53   : > { %758 = vmatprep.subr.bf16.mxu1 %v1776_v2  ;;  %v1779_v4 = vld [vmem:[%s2281_s7 + $0x24] ss:$16 sps:$4 sm:$0xff]   ;;  %v1781_v5 = vld [vmem:[%s2281_s7 + $0x20] ss:$16 sps:$4 sm:$0xff]   ;;  %v1827_v48 = vld [vmem:[%s2281_s7 + $0x8] ss:$16 sps:$4 sm:$0xff]  }
  0x54   : > { %759 = vmatpush1.bf16.msra.mxu1 %v1778_v3  ;;  %v1782_v6 = vld [vmem:[%s2281_s7 + $0x44] ss:$16 sps:$4 sm:$0xff]   ;;  %v1784_v7 = vld [vmem:[%s2281_s7 + $0x40] ss:$16 sps:$4 sm:$0xff]   ;;  %v1832_v49 = vld [vmem:[%s2281_s7 + $0x2c] ss:$16 sps:$4 sm:$0xff]  }
  0x55   : > { %760 = vmatprep.subr.bf16.mxu1 %v1779_v4  ;;  %v1785_v8 = vld [vmem:[%s2281_s7 + $0x64] ss:$16 sps:$4 sm:$0xff]   ;;  %v1787_v9 = vld [vmem:[%s2281_s7 + $0x60] ss:$16 sps:$4 sm:$0xff]   ;;  %v1830_v52 = vld [vmem:[%s2281_s7 + $0x28] ss:$16 sps:$4 sm:$0xff]  }
  0x56   : > { %v1788_v10 = vld [vmem:[%s2281_s7 + $0x84] ss:$16 sps:$4 sm:$0xff]   ;;  %v1790_v11 = vld [vmem:[%s2281_s7 + $0x80] ss:$16 sps:$4 sm:$0xff]   ;;  %v1835_v53 = vld [vmem:[%s2281_s7 + $0x4c] ss:$16 sps:$4 sm:$0xff]  }
  0x57   : > { %v1791_v12 = vld [vmem:[%s2281_s7 + $0xa4] ss:$16 sps:$4 sm:$0xff]   ;;  %v1793_v13 = vld [vmem:[%s2281_s7 + $0xa0] ss:$16 sps:$4 sm:$0xff]   ;;  %v1833_v54 = vld [vmem:[%s2281_s7 + $0x48] ss:$16 sps:$4 sm:$0xff]  }
  0x58   : > { %761 = vmatpush1.bf16.msra.mxu1 %v1781_v5  ;;  %v1794_v14 = vld [vmem:[%s2281_s7 + $0xc4] ss:$16 sps:$4 sm:$0xff]   ;;  %v1796_v15 = vld [vmem:[%s2281_s7 + $0xc0] ss:$16 sps:$4 sm:$0xff]   ;;  %v1838_v55 = vld [vmem:[%s2281_s7 + $0x6c] ss:$16 sps:$4 sm:$0xff]  }
  0x59   : > { %762 = vmatprep.subr.bf16.mxu1 %v1782_v6  ;;  %v1797_v16 = vld [vmem:[%s2281_s7 + $0xe4] ss:$16 sps:$4 sm:$0xff]   ;;  %v1799_v17 = vld [vmem:[%s2281_s7 + $0xe0] ss:$16 sps:$4 sm:$0xff]   ;;  %v1836_v56 = vld [vmem:[%s2281_s7 + $0x68] ss:$16 sps:$4 sm:$0xff]  }
  0x5a   : > { %v1800_v18 = vld [vmem:[%s2281_s7 + $0x104] ss:$16 sps:$4 sm:$0xff]   ;;  %v1802_v19 = vld [vmem:[%s2281_s7 + $0x100] ss:$16 sps:$4 sm:$0xff]   ;;  %v1841_v57 = vld [vmem:[%s2281_s7 + $0x8c] ss:$16 sps:$4 sm:$0xff]  }
  0x5b   : > { %v1803_v20 = vld [vmem:[%s2281_s7 + $0x124] ss:$16 sps:$4 sm:$0xff]   ;;  %v1805_v21 = vld [vmem:[%s2281_s7 + $0x120] ss:$16 sps:$4 sm:$0xff]   ;;  %v1839_v58 = vld [vmem:[%s2281_s7 + $0x88] ss:$16 sps:$4 sm:$0xff]  }
  0x5c   : > { %763 = vmatpush1.bf16.msra.mxu1 %v1784_v7  ;;  %v1806_v22 = vld [vmem:[%s2281_s7 + $0x144] ss:$16 sps:$4 sm:$0xff]   ;;  %v1808_v23 = vld [vmem:[%s2281_s7 + $0x140] ss:$16 sps:$4 sm:$0xff]   ;;  %v1844_v59 = vld [vmem:[%s2281_s7 + $0xac] ss:$16 sps:$4 sm:$0xff]  }
  0x5d   : > { %764 = vmatprep.subr.bf16.mxu1 %v1785_v8  ;;  %v1809_v24 = vld [vmem:[%s2281_s7 + $0x164] ss:$16 sps:$4 sm:$0xff]   ;;  %v1811_v25 = vld [vmem:[%s2281_s7 + $0x160] ss:$16 sps:$4 sm:$0xff]   ;;  %v1842_v60 = vld [vmem:[%s2281_s7 + $0xa8] ss:$16 sps:$4 sm:$0xff]  }
  0x5e   : > { %v1812_v26 = vld [vmem:[%s2281_s7 + $0x184] ss:$16 sps:$4 sm:$0xff]   ;;  %v1877_v28 = vld [vmem:[%s2311_s9] ss:$8 sps:$4 sm:$0xff]   ;;  %v1880_v30 = vld [vmem:[%s2311_s9 + $0x10] ss:$8 sps:$4 sm:$0xff]  }
  0x5f   : > { %v1875_v27 = vld [vmem:[%s2311_s9 + $0x4] ss:$8 sps:$4 sm:$0xff]   ;;  %v1878_v29 = vld [vmem:[%s2311_s9 + $0x14] ss:$8 sps:$4 sm:$0xff]   ;;  %v1814_v31 = vld [vmem:[%s2281_s7 + $0x180] ss:$16 sps:$4 sm:$0xff]  }
  0x60   : > { %765 = vmatpush1.bf16.msra.mxu1 %v1787_v9  ;;  %1304 = vmatprep.subr.bf16.mxu0 %v1875_v27  ;;  %v1881_v32 = vld [vmem:[%s2311_s9 + $0x24] ss:$8 sps:$4 sm:$0xff]   ;;  %v1817_v34 = vld [vmem:[%s2281_s7 + $0x1a0] ss:$16 sps:$4 sm:$0xff]   ;;  %v1884_v37 = vld [vmem:[%s2311_s9 + $0x34] ss:$8 sps:$4 sm:$0xff]  }
  0x61   : > { %766 = vmatprep.subr.bf16.mxu1 %v1788_v10  ;;  %1305 = vmatpush1.bf16.msra.mxu0 %v1877_v28  ;;  %v1815_v33 = vld [vmem:[%s2281_s7 + $0x1a4] ss:$16 sps:$4 sm:$0xff]   ;;  %v1883_v35 = vld [vmem:[%s2311_s9 + $0x20] ss:$8 sps:$4 sm:$0xff]   ;;  %v1886_v38 = vld [vmem:[%s2311_s9 + $0x30] ss:$8 sps:$4 sm:$0xff]  }
  0x62   : > { %1306 = vmatprep.subr.bf16.mxu0 %v1878_v29  ;;  %v1818_v36 = vld [vmem:[%s2281_s7 + $0x1c4] ss:$16 sps:$4 sm:$0xff]   ;;  %v1820_v39 = vld [vmem:[%s2281_s7 + $0x1c0] ss:$16 sps:$4 sm:$0xff]   ;;  %v1847_v61 = vld [vmem:[%s2281_s7 + $0xcc] ss:$16 sps:$4 sm:$0xff]  }
  0x63   : > { %v1887_v40 = vld [vmem:[%s2311_s9 + $0x44] ss:$8 sps:$4 sm:$0xff]   ;;  %v1889_v42 = vld [vmem:[%s2311_s9 + $0x40] ss:$8 sps:$4 sm:$0xff]   ;;  %v1890_v44 = vld [vmem:[%s2311_s9 + $0x54] ss:$8 sps:$4 sm:$0xff]  }
  0x64   : > { %767 = vmatpush1.bf16.msra.mxu1 %v1790_v11  ;;  %v1821_v41 = vld [vmem:[%s2281_s7 + $0x1e4] ss:$16 sps:$4 sm:$0xff]   ;;  %v1823_v43 = vld [vmem:[%s2281_s7 + $0x1e0] ss:$16 sps:$4 sm:$0xff]   ;;  %v1845_v62 = vld [vmem:[%s2281_s7 + $0xc8] ss:$16 sps:$4 sm:$0xff]  }
  0x65   : > { %768 = vmatprep.subr.bf16.mxu1 %v1791_v12  ;;  %1307 = vmatpush1.bf16.msra.mxu0 %v1880_v30  ;;  %v1892_v47 = vld [vmem:[%s2311_s9 + $0x50] ss:$8 sps:$4 sm:$0xff]   ;;  %v1893_v50 = vld [vmem:[%s2311_s9 + $0x64] ss:$8 sps:$4 sm:$0xff]   ;;  %v1895_v51 = vld [vmem:[%s2311_s9 + $0x60] ss:$8 sps:$4 sm:$0xff]  }
  0x66   : > { %1308 = vmatprep.subr.bf16.mxu0 %v1881_v32  ;;  %v1850_v63 = vld [vmem:[%s2281_s7 + $0xec] ss:$16 sps:$4 sm:$0xff]   ;;  %v1848_v0 = vld [vmem:[%s2281_s7 + $0xe8] ss:$16 sps:$4 sm:$0xff]   ;;  %s1634_s15 = sshll.u32 %s2111_s21, 1  ;;  %p1699_p4 = scmp.ne.s32.totalorder %s2111_s21, 3 }
  0x67   : > { %v1851_v2 = vld [vmem:[%s2281_s7 + $0x108] ss:$16 sps:$4 sm:$0xff]   ;;  %v1856_v3 = vld [vmem:[%s2281_s7 + $0x12c] ss:$16 sps:$4 sm:$0xff]   ;;  %s971_s30 = scalar_lea.vmem %s2497_s5, %s1634_s15 }
  0x68   : > { %769 = vmatpush1.bf16.msra.mxu1 %v1793_v13  ;;  %v1854_v4 = vld [vmem:[%s2281_s7 + $0x128] ss:$16 sps:$4 sm:$0xff]   ;;  %v1859_v5 = vld [vmem:[%s2281_s7 + $0x14c] ss:$16 sps:$4 sm:$0xff]  }
  0x69   : > { %770 = vmatprep.subr.bf16.mxu1 %v1794_v14  ;;  %1309 = vmatpush1.bf16.msra.mxu0 %v1883_v35  ;;  %v1857_v6 = vld [vmem:[%s2281_s7 + $0x148] ss:$16 sps:$4 sm:$0xff]   ;;  %v1862_v7 = vld [vmem:[%s2281_s7 + $0x16c] ss:$16 sps:$4 sm:$0xff]  }
  0x6a   : > { %1310 = vmatprep.subr.bf16.mxu0 %v1884_v37  ;;  %v1860_v8 = vld [vmem:[%s2281_s7 + $0x168] ss:$16 sps:$4 sm:$0xff]   ;;  %v1865_v9 = vld [vmem:[%s2281_s7 + $0x18c] ss:$16 sps:$4 sm:$0xff]   ;;  %v2128_v37 = vmov 0  }
  0x6b   : > { %v1863_v10 = vld [vmem:[%s2281_s7 + $0x188] ss:$16 sps:$4 sm:$0xff]   ;;  %v1868_v11 = vld [vmem:[%s2281_s7 + $0x1ac] ss:$16 sps:$4 sm:$0xff]   ;;  %1775 = vset.pattern.permute.xlu0 %v2128_v37 }
  0x6c   : > { %771 = vmatpush1.bf16.msra.mxu1 %v1796_v15  ;;  %v1866_v12 = vld [vmem:[%s2281_s7 + $0x1a8] ss:$16 sps:$4 sm:$0xff]   ;;  %v1871_v13 = vld [vmem:[%s2281_s7 + $0x1cc] ss:$16 sps:$4 sm:$0xff]  }
  0x6d   : > { %772 = vmatprep.subr.bf16.mxu1 %v1797_v16  ;;  %1311 = vmatpush1.bf16.msra.mxu0 %v1886_v38  ;;  %v1869_v14 = vld [vmem:[%s2281_s7 + $0x1c8] ss:$16 sps:$4 sm:$0xff]   ;;  %v1874_v15 = vld [vmem:[%s2281_s7 + $0x1ec] ss:$16 sps:$4 sm:$0xff]  }
  0x6e   : > { %1312 = vmatprep.subr.bf16.mxu0 %v1887_v40  ;;  %v1872_v16 = vld [vmem:[%s2281_s7 + $0x1e8] ss:$16 sps:$4 sm:$0xff]   ;;  %v1911_v27 = vld [vmem:[%s2311_s9 + $0xc4] ss:$8 sps:$4 sm:$0xff]   ;;  %v1914_v29 = vld [vmem:[%s2311_s9 + $0xd4] ss:$8 sps:$4 sm:$0xff]  }
  0x6f   : > { %v1913_v28 = vld [vmem:[%s2311_s9 + $0xc0] ss:$8 sps:$4 sm:$0xff]   ;;  %v1916_v30 = vld [vmem:[%s2311_s9 + $0xd0] ss:$8 sps:$4 sm:$0xff]   ;;  %v1925_v35 = vld [vmem:[%s2311_s9 + $0x104] ss:$8 sps:$4 sm:$0xff]  }
  0x70   : > { %773 = vmatpush1.bf16.msra.mxu1 %v1799_v17  ;;  %v1896_v17 = vld [vmem:[%s2311_s9 + $0x74] ss:$8 sps:$4 sm:$0xff]   ;;  %v1919_v32 = vld [vmem:[%s2311_s9 + $0xe0] ss:$8 sps:$4 sm:$0xff]  }
  0x71   : > { %774 = vmatprep.subr.bf16.mxu1 %v1800_v18  ;;  %1313 = vmatpush1.bf16.msra.mxu0 %v1889_v42  ;;  %v1898_v18 = vld [vmem:[%s2311_s9 + $0x70] ss:$8 sps:$4 sm:$0xff]   ;;  %v1395_v38 = vld [vmem:[%s2270_s19 + $0x8] sm:$0xff]  ;;  %v2402_v42 = vld [vmem:[%s405_s14] sm:$0xf] }
  0x72   : > { %1314 = vmatprep.subr.bf16.mxu0 %v1890_v44  ;;  %v1947_v37 = vld [vmem:[%s2311_s9 + $0x180] ss:$8 sps:$4 sm:$0xff]  }
  0x74   : > { %775 = vmatpush1.bf16.msra.mxu1 %v1802_v19  ;;  %v1899_v19 = vld [vmem:[%s2311_s9 + $0x84] ss:$8 sps:$4 sm:$0xff]  }
  0x75   : > { %776 = vmatprep.subr.bf16.mxu1 %v1803_v20  ;;  %1315 = vmatpush1.bf16.msra.mxu0 %v1892_v47  ;;  %v1901_v20 = vld [vmem:[%s2311_s9 + $0x80] ss:$8 sps:$4 sm:$0xff]  }
  0x76   : > { %1316 = vmatprep.subr.bf16.mxu0 %v1893_v50 }
  0x78   : > { %777 = vmatpush1.bf16.msra.mxu1 %v1805_v21  ;;  %v1902_v21 = vld [vmem:[%s2311_s9 + $0x94] ss:$8 sps:$4 sm:$0xff]  }
  0x79   : > { %778 = vmatprep.subr.bf16.mxu1 %v1806_v22  ;;  %1317 = vmatpush1.bf16.msra.mxu0 %v1895_v51  ;;  %v1904_v22 = vld [vmem:[%s2311_s9 + $0x90] ss:$8 sps:$4 sm:$0xff]  }
  0x7a   : > { %1318 = vmatprep.subr.bf16.mxu0 %v1896_v17  ;;  %v1934_v17 = vld [vmem:[%s2311_s9 + $0x134] ss:$8 sps:$4 sm:$0xff]  }
  0x7c   : > { %779 = vmatpush1.bf16.msra.mxu1 %v1808_v23  ;;  %v1905_v23 = vld [vmem:[%s2311_s9 + $0xa4] ss:$8 sps:$4 sm:$0xff]  }
  0x7d   : > { %780 = vmatprep.subr.bf16.mxu1 %v1809_v24  ;;  %1319 = vmatpush1.bf16.msra.mxu0 %v1898_v18  ;;  %v1907_v24 = vld [vmem:[%s2311_s9 + $0xa0] ss:$8 sps:$4 sm:$0xff]   ;;  %v1932_v18 = vld [vmem:[%s2311_s9 + $0x130] ss:$8 sps:$4 sm:$0xff]  }
  0x7e   : > { %1320 = vmatprep.subr.bf16.mxu0 %v1899_v19  ;;  %v1937_v19 = vld [vmem:[%s2311_s9 + $0x144] ss:$8 sps:$4 sm:$0xff]  }
  0x80   : > { %781 = vmatpush1.bf16.msra.mxu1 %v1811_v25  ;;  %v1908_v25 = vld [vmem:[%s2311_s9 + $0xb4] ss:$8 sps:$4 sm:$0xff]  }
  0x81   : > { %782 = vmatprep.subr.bf16.mxu1 %v1812_v26  ;;  %1321 = vmatpush1.bf16.msra.mxu0 %v1901_v20  ;;  %v1910_v26 = vld [vmem:[%s2311_s9 + $0xb0] ss:$8 sps:$4 sm:$0xff]   ;;  %v1935_v20 = vld [vmem:[%s2311_s9 + $0x140] ss:$8 sps:$4 sm:$0xff]  }
  0x82   : > { %1322 = vmatprep.subr.bf16.mxu0 %v1902_v21  ;;  %v1940_v21 = vld [vmem:[%s2311_s9 + $0x154] ss:$8 sps:$4 sm:$0xff]  }
  0x84   : > { %783 = vmatpush1.bf16.msra.mxu1 %v1814_v31  ;;  %v1917_v31 = vld [vmem:[%s2311_s9 + $0xe4] ss:$8 sps:$4 sm:$0xff]  }
  0x85   : > { %784 = vmatprep.subr.bf16.mxu1 %v1815_v33  ;;  %1323 = vmatpush1.bf16.msra.mxu0 %v1904_v22  ;;  %v1920_v33 = vld [vmem:[%s2311_s9 + $0xf4] ss:$8 sps:$4 sm:$0xff]   ;;  %v1938_v22 = vld [vmem:[%s2311_s9 + $0x150] ss:$8 sps:$4 sm:$0xff]  }
  0x86   : > { %1324 = vmatprep.subr.bf16.mxu0 %v1905_v23  ;;  %v1943_v23 = vld [vmem:[%s2311_s9 + $0x164] ss:$8 sps:$4 sm:$0xff]  }
  0x88   : > { %785 = vmatpush1.bf16.msra.mxu1 %v1817_v34  ;;  %v1922_v34 = vld [vmem:[%s2311_s9 + $0xf0] ss:$8 sps:$4 sm:$0xff]  }
  0x89   : > { %786 = vmatprep.subr.bf16.mxu1 %v1818_v36  ;;  %1325 = vmatpush1.bf16.msra.mxu0 %v1907_v24  ;;  %v1394_v36 = vld [vmem:[%s2270_s19] sm:$0xff] }
  0x8a   : > { %1326 = vmatprep.subr.bf16.mxu0 %v1908_v25  ;;  %1398 = vperm.xlu0 %1775, %v1394_v36   ;;  %v1941_v25 = vld [vmem:[%s2311_s9 + $0x160] ss:$8 sps:$4 sm:$0xff]  }
  0x8c   : > { %787 = vmatpush1.bf16.msra.mxu1 %v1820_v39  ;;  %v408_v39 = vlaneseq }
  0x8d   : > { %788 = vmatprep.subr.bf16.mxu1 %v1821_v41  ;;  %1327 = vmatpush1.bf16.msra.mxu0 %v1910_v26 }
  0x8e   : > { %1328 = vmatprep.subr.bf16.mxu0 %v1911_v27  ;;  %1403 = vperm.xlu0 %1775, %v1395_v38   ;;  %v2396_v40 = vshrl.u32 %v408_v39, 7  ;;  %v1946_v27 = vld [vmem:[%s2311_s9 + $0x174] ss:$8 sps:$4 sm:$0xff]  }
  0x90   : > { %789 = vmatpush1.bf16.msra.mxu1 %v1823_v43  ;;  %v410_v41 = vsub.s32 0, %v2396_v40  ;;  %v414_v43 = vsub.s32 1, %v2396_v40  ;;  %v418_v24 = vsub.s32 2, %v2396_v40  ;;  %v422_v26 = vsub.s32 3, %v2396_v40 }
  0x91   : > { %801 = vmatprep.subr.bf16.mxu1 %v1829_v45  ;;  %1329 = vmatpush1.bf16.msra.mxu0 %v1913_v28 }
  0x92   : > { %1330 = vmatprep.subr.bf16.mxu0 %v1914_v29  ;;  %v411_v44 = vrot.slane %v2402_v42, %v410_v41  ;;  %v415_v45 = vrot.slane %v2402_v42, %v414_v43  ;;  %v419_v28 = vrot.slane %v2402_v42, %v418_v24  ;;  %v423_v29 = vrot.slane %v2402_v42, %v422_v26 }
  0x93   : > { %791 = vmatmul.mubr.bf16.vlgmr.msra.gmra.mrb[0].mxu1 %v2335_v46 }
  0x94   : > { %802 = vmatpush1.bf16.msra.mxu1 %v1827_v48  ;;  %833 = vmatprep.mubr.bf16.mxu1 %v2277_v1  ;;  %v1853_v1 = vld [vmem:[%s2281_s7 + $0x10c] ss:$16 sps:$4 sm:$0xff]  }
  0x95   : > { %803 = vmatprep.subr.bf16.mxu1 %v1832_v49  ;;  %1331 = vmatpush1.bf16.msra.mxu0 %v1916_v30  ;;  %v1944_v30 = vld [vmem:[%s2311_s9 + $0x170] ss:$8 sps:$4 sm:$0xff]  }
  0x96   : > { %1332 = vmatprep.subr.bf16.mxu0 %v1917_v31  ;;  %v1949_v31 = vld [vmem:[%s2311_s9 + $0x184] ss:$8 sps:$4 sm:$0xff]  }
  0x98   : > { %804 = vmatpush1.bf16.msra.mxu1 %v1830_v52 }
  0x99   : > { %805 = vmatprep.subr.bf16.mxu1 %v1835_v53  ;;  %1333 = vmatpush1.bf16.msra.mxu0 %v1919_v32 }
  0x9a   : > { %1334 = vmatprep.subr.bf16.mxu0 %v1920_v33 }
  0x9c   : > { %806 = vmatpush1.bf16.msra.mxu1 %v1833_v54 }
  0x9d   : > { %807 = vmatprep.subr.bf16.mxu1 %v1838_v55  ;;  %1335 = vmatpush1.bf16.msra.mxu0 %v1922_v34 }
  0x9e   : > { %1347 = vmatprep.subr.bf16.mxu0 %v1925_v35 }
  0xa0   : > { %808 = vmatpush1.bf16.msra.mxu1 %v1836_v56 }
  0xa1   : > { %809 = vmatprep.subr.bf16.mxu1 %v1841_v57 }
  0xa4   : > { %810 = vmatpush1.bf16.msra.mxu1 %v1839_v58 }
  0xa5   : > { %811 = vmatprep.subr.bf16.mxu1 %v1844_v59 }
  0xa8   : > { %812 = vmatpush1.bf16.msra.mxu1 %v1842_v60 }
  0xa9   : > { %813 = vmatprep.subr.bf16.mxu1 %v1847_v61 }
  0xac   : > { %814 = vmatpush1.bf16.msra.mxu1 %v1845_v62 }
  0xad   : > { %815 = vmatprep.subr.bf16.mxu1 %v1850_v63 }
  0xb0   : > { %816 = vmatpush1.bf16.msra.mxu1 %v1848_v0 }
  0xb1   : > { %817 = vmatprep.subr.bf16.mxu1 %v1853_v1 }
  0xb4   : > { %818 = vmatpush1.bf16.msra.mxu1 %v1851_v2 }
  0xb5   : > { %819 = vmatprep.subr.bf16.mxu1 %v1856_v3 }
  0xb8   : > { %820 = vmatpush1.bf16.msra.mxu1 %v1854_v4 }
  0xb9   : > { %821 = vmatprep.subr.bf16.mxu1 %v1859_v5 }
  0xbc   : > { %822 = vmatpush1.bf16.msra.mxu1 %v1857_v6 }
  0xbd   : > { %823 = vmatprep.subr.bf16.mxu1 %v1862_v7 }
  0xc0   : > { %824 = vmatpush1.bf16.msra.mxu1 %v1860_v8 }
  0xc1   : > { %825 = vmatprep.subr.bf16.mxu1 %v1865_v9 }
  0xc4   : > { %826 = vmatpush1.bf16.msra.mxu1 %v1863_v10 }
  0xc5   : > { %827 = vmatprep.subr.bf16.mxu1 %v1868_v11 }
  0xc8   : > { %828 = vmatpush1.bf16.msra.mxu1 %v1866_v12  ;;  %v1923_v12 = vld [vmem:[%s2311_s9 + $0x100] ss:$8 sps:$4 sm:$0xff]  }
  0xc9   : > { %829 = vmatprep.subr.bf16.mxu1 %v1871_v13  ;;  %v1928_v13 = vld [vmem:[%s2311_s9 + $0x114] ss:$8 sps:$4 sm:$0xff]  }
  0xcc   : > { %830 = vmatpush1.bf16.msra.mxu1 %v1869_v14  ;;  %v1926_v14 = vld [vmem:[%s2311_s9 + $0x110] ss:$8 sps:$4 sm:$0xff]  }
  0xcd   : > { %831 = vmatprep.subr.bf16.mxu1 %v1874_v15  ;;  %v1931_v15 = vld [vmem:[%s2311_s9 + $0x124] ss:$8 sps:$4 sm:$0xff]  }
  0xd0   : > { %832 = vmatpush1.bf16.msra.mxu1 %v1872_v16  ;;  %v1929_v16 = vld [vmem:[%s2311_s9 + $0x120] ss:$8 sps:$4 sm:$0xff]  }
  0xd3   : > { %834 = vmatmul.mubr.bf16.vlgmr.msra.gmra.mrb[4].mxu1 %v2335_v46 }
 0x166   : > { %v792_v46 = vpop.f32.mrb[0].mxu1 }
 0x167   : > { %v793_v47 = vadd.f32 %v792_v46, %v411_v44  ;;  %v794_v48 = vpop.f32.mrb[1].mxu1 }
 0x168   : > { %v795_v49 = vadd.f32 %v794_v48, %v415_v45  ;;  %v796_v50 = vpop.f32.mrb[2].mxu1 }
 0x169   : > { %v1625_v51 = vmul.f32 -1.442695, %v793_v47  ;;  %v797_v52 = vadd.f32 %v796_v50, %v411_v44  ;;  %v798_v53 = vpop.f32.mrb[3].mxu1  ;;  %v1955_v50 = vld [vmem:[%s2311_s9 + $0x1a4] ss:$8 sps:$4 sm:$0xff]  }
 0x16a   : > { %v1626_v54 = vmul.f32 -1.442695, %v795_v49  ;;  %v799_v55 = vadd.f32 %v798_v53, %v415_v45  ;;  %v1952_v45 = vld [vmem:[%s2311_s9 + $0x194] ss:$8 sps:$4 sm:$0xff]   ;;  %v1956_v53 = vld [vmem:[%s2311_s9 + $0x1b0] ss:$8 sps:$4 sm:$0xff]  }
 0x16b   : > { %1971 = vpow2.f32 %v1625_v51  ;;  %v1629_v56 = vmul.f32 -1.442695, %v797_v52  ;;  %v1953_v51 = vld [vmem:[%s2311_s9 + $0x1a0] ss:$8 sps:$4 sm:$0xff]  }
 0x16c   : > { %1973 = vpow2.f32 %v1626_v54  ;;  %v1630_v57 = vmul.f32 -1.442695, %v799_v55 }
 0x16d   : > { %1975 = vpow2.f32 %v1629_v56 }
 0x16e   : > { %1977 = vpow2.f32 %v1630_v57 }
 0x175   : > { %v1972_v58 = vpop.eup %1971 }
 0x176   : > { %v1974_v59 = vpop.eup %1973  ;;  %v868_v60 = vadd.f32 1.0, %v1972_v58 }
 0x177   : > { %v1976_v61 = vpop.eup %1975  ;;  %v869_v62 = vadd.f32 1.0, %v1974_v59 }
 0x178   : > { %v1978_v63 = vpop.eup %1977  ;;  %1979 = vrcp.f32 %v868_v60  ;;  %v872_v0 = vadd.f32 1.0, %v1976_v61 }
 0x179   : > { %1981 = vrcp.f32 %v869_v62  ;;  %v873_v1 = vadd.f32 1.0, %v1978_v63  ;;  %v1959_v62 = vld [vmem:[%s2311_s9 + $0x1c0] ss:$8 sps:$4 sm:$0xff]  }
 0x17a   : > { %1983 = vrcp.f32 %v872_v0  ;;  %v1964_v0 = vld [vmem:[%s2311_s9 + $0x1d4] ss:$8 sps:$4 sm:$0xff]  }
 0x17b   : > { %1985 = vrcp.f32 %v873_v1  ;;  %v1962_v1 = vld [vmem:[%s2311_s9 + $0x1d0] ss:$8 sps:$4 sm:$0xff]  }
 0x182   : > { %v1980_v2 = vpop.eup %1979 }
 0x183   : > { %v1982_v3 = vpop.eup %1981  ;;  %v892_v6 = vmul.f32 %v1980_v2, %v793_v47  ;;  %v1967_v2 = vld [vmem:[%s2311_s9 + $0x1e4] ss:$8 sps:$4 sm:$0xff]  }
 0x184   : > { %v1984_v4 = vpop.eup %1983  ;;  %v893_v8 = vmul.f32 %v1982_v3, %v795_v49  ;;  %v1950_v49 = vld [vmem:[%s2311_s9 + $0x190] ss:$8 sps:$4 sm:$0xff]   ;;  %v1965_v3 = vld [vmem:[%s2311_s9 + $0x1e0] ss:$8 sps:$4 sm:$0xff]  }
 0x185   : > { %v1986_v5 = vpop.eup %1985  ;;  %v896_v7 = vmul.f32 %v1984_v4, %v797_v52  ;;  %v1958_v52 = vld [vmem:[%s2311_s9 + $0x1b4] ss:$8 sps:$4 sm:$0xff]  }
 0x186   : > { %v897_v9 = vmul.f32 %v1986_v5, %v799_v55  ;;  %v1961_v55 = vld [vmem:[%s2311_s9 + $0x1c4] ss:$8 sps:$4 sm:$0xff]   ;;  %v1970_v4 = vld [vmem:[%s2311_s9 + $0x1f4] ss:$8 sps:$4 sm:$0xff]  }
 0x187   : > { %v900_v10 = vpack.c.bf16 %v896_v7, %v892_v6 }
 0x188   : > { %v901_v11 = vpack.c.bf16 %v897_v9, %v893_v8  ;;  %v1968_v8 = vld [vmem:[%s2311_s9 + $0x1f0] ss:$8 sps:$4 sm:$0xff]  }
 0x18a   : > { %1336 = vmatprep.mubr.bf16.mxu0 %v901_v11 }
 0x18b   : > { %1337 = vmatmul.mubr.bf16.vlgmr.msra.gmra.mrb[0].mxu0 %v900_v10 }
 0x18c   : > { %1348 = vmatpush1.bf16.msra.mxu0 %v1923_v12 }
 0x18d   : > { %1349 = vmatprep.subr.bf16.mxu0 %v1928_v13 }
 0x190   : > { %1350 = vmatpush1.bf16.msra.mxu0 %v1926_v14 }
 0x191   : > { %1351 = vmatprep.subr.bf16.mxu0 %v1931_v15 }
 0x194   : > { %1352 = vmatpush1.bf16.msra.mxu0 %v1929_v16  ;;  %v972_v16 = vld [vmem:[%s971_s30] sm:$0x3] }
 0x195   : > { %1353 = vmatprep.subr.bf16.mxu0 %v1934_v17  ;;  %v977_v17 = vrot.slane %v972_v16, %v410_v41 }
 0x198   : > { %1354 = vmatpush1.bf16.msra.mxu0 %v1932_v18  ;;  %v1399_v18 = vpop.permute.xlu0 %1398 }
 0x199   : > { %1355 = vmatprep.subr.bf16.mxu0 %v1937_v19  ;;  %v981_v19 = vrot.slane %v972_v16, %v414_v43 }
 0x19c   : > { %1356 = vmatpush1.bf16.msra.mxu0 %v1935_v20 }
 0x19d   : > { %1357 = vmatprep.subr.bf16.mxu0 %v1940_v21 }
 0x1a0   : > { %1358 = vmatpush1.bf16.msra.mxu0 %v1938_v22 }
 0x1a1   : > { %1359 = vmatprep.subr.bf16.mxu0 %v1943_v23  ;;  %v1390_v23 = vld [vmem:[#allocation2] sm:$0xff] }
 0x1a4   : > { %1360 = vmatpush1.bf16.msra.mxu0 %v1941_v25 }
 0x1a5   : > { %1361 = vmatprep.subr.bf16.mxu0 %v1946_v27  ;;  %v1391_v27 = vld [vmem:[#allocation2 + $0x8] sm:$0xff] }
 0x1a6   : > { %v835_v32 = vpop.f32.mrb[4].mxu1 }
 0x1a7   : > { %v836_v33 = vadd.f32 %v835_v32, %v419_v28  ;;  %v837_v34 = vpop.f32.mrb[5].mxu1  ;;  %v1392_v32 = vld [vmem:[#allocation2 + $0x10] sm:$0xff] }
 0x1a8   : > { %v838_v35 = vadd.f32 %v837_v34, %v423_v29  ;;  %v839_v36 = vpop.f32.mrb[6].mxu1  ;;  %1362 = vmatpush1.bf16.msra.mxu0 %v1944_v30  ;;  %v1404_v30 = vpop.permute.xlu0 %1403 }
 0x1a9   : > { %v1627_v38 = vmul.f32 -1.442695, %v836_v33  ;;  %v840_v39 = vadd.f32 %v839_v36, %v419_v28  ;;  %v841_v44 = vpop.f32.mrb[7].mxu1  ;;  %1363 = vmatprep.subr.bf16.mxu0 %v1949_v31 }
 0x1aa   : > { %v1628_v42 = vmul.f32 -1.442695, %v838_v35  ;;  %v842_v46 = vadd.f32 %v841_v44, %v423_v29 }
 0x1ab   : > { %1987 = vpow2.f32 %v1627_v38  ;;  %v1631_v47 = vmul.f32 -1.442695, %v840_v39 }
 0x1ac   : > { %1989 = vpow2.f32 %v1628_v42  ;;  %v1632_v48 = vmul.f32 -1.442695, %v842_v46  ;;  %1364 = vmatpush1.bf16.msra.mxu0 %v1947_v37 }
 0x1ad   : > { %1991 = vpow2.f32 %v1631_v47  ;;  %1365 = vmatprep.subr.bf16.mxu0 %v1952_v45 }
 0x1ae   : > { %1993 = vpow2.f32 %v1632_v48 }
 0x1b0   : > { %1366 = vmatpush1.bf16.msra.mxu0 %v1950_v49 }
 0x1b1   : > { %1367 = vmatprep.subr.bf16.mxu0 %v1955_v50 }
 0x1b4   : > { %1368 = vmatpush1.bf16.msra.mxu0 %v1953_v51 }
 0x1b5   : > { %v1988_v54 = vpop.eup %1987  ;;  %1369 = vmatprep.subr.bf16.mxu0 %v1958_v52 }
 0x1b6   : > { %v1990_v56 = vpop.eup %1989  ;;  %v870_v57 = vadd.f32 1.0, %v1988_v54 }
 0x1b7   : > { %v1992_v58 = vpop.eup %1991  ;;  %v871_v59 = vadd.f32 1.0, %v1990_v56 }
 0x1b8   : > { %v1994_v60 = vpop.eup %1993  ;;  %1995 = vrcp.f32 %v870_v57  ;;  %v874_v61 = vadd.f32 1.0, %v1992_v58  ;;  %1370 = vmatpush1.bf16.msra.mxu0 %v1956_v53 }
 0x1b9   : > { %1997 = vrcp.f32 %v871_v59  ;;  %v875_v63 = vadd.f32 1.0, %v1994_v60  ;;  %1371 = vmatprep.subr.bf16.mxu0 %v1961_v55 }
 0x1ba   : > { %1999 = vrcp.f32 %v874_v61 }
 0x1bb   : > { %2001 = vrcp.f32 %v875_v63 }
 0x1bc   : > { %1372 = vmatpush1.bf16.msra.mxu0 %v1959_v62 }
 0x1bd   : > { %1373 = vmatprep.subr.bf16.mxu0 %v1964_v0 }
 0x1c0   : > { %1374 = vmatpush1.bf16.msra.mxu0 %v1962_v1 }
 0x1c1   : > { %1375 = vmatprep.subr.bf16.mxu0 %v1967_v2 }
 0x1c2   : > { %v1996_v5 = vpop.eup %1995 }
 0x1c3   : > { %v1998_v6 = vpop.eup %1997  ;;  %v894_v10 = vmul.f32 %v1996_v5, %v836_v33 }
 0x1c4   : > { %v2000_v7 = vpop.eup %1999  ;;  %1376 = vmatpush1.bf16.msra.mxu0 %v1965_v3  ;;  %v895_v12 = vmul.f32 %v1998_v6, %v838_v35  ;;  %v1393_v35 = vld [vmem:[#allocation2 + $0x18] sm:$0xff] }
 0x1c5   : > { %v2002_v9 = vpop.eup %2001  ;;  %v898_v11 = vmul.f32 %v2000_v7, %v840_v39  ;;  %1377 = vmatprep.subr.bf16.mxu0 %v1970_v4 }
 0x1c6   : > { %v899_v13 = vmul.f32 %v2002_v9, %v842_v46 }
 0x1c7   : > { %v902_v14 = vpack.c.bf16 %v898_v11, %v894_v10 }
 0x1c8   : > { %1378 = vmatpush1.bf16.msra.mxu0 %v1968_v8  ;;  %v903_v15 = vpack.c.bf16 %v899_v13, %v895_v12 }
 0x1ca   : > { %1379 = vmatprep.mubr.bf16.mxu0 %v903_v15 }
 0x1cb   : > { %1380 = vmatmul.mubr.bf16.vlgmr.msra.gmra.mrb[0].mxu0 %v902_v14 }
 0x29e   : > { %v1381_v20 = vpop.f32.mrb[0].mxu0 }
 0x29f   : > { %v1707_v21 = vadd.f32 %v1381_v20, %v977_v17  ;;  %v1383_v22 = vpop.f32.mrb[1].mxu0 }
 0x2a0   : > { %v1708_v24 = vadd.f32 %v1383_v22, %v981_v19  ;;  %v1385_v25 = vpop.f32.mrb[2].mxu0 }
 0x2a1   : > { %v1406_v26 = vmul.f32 %v1707_v21, %v1399_v18  ;;  %v1709_v28 = vadd.f32 %v1385_v25, %v977_v17  ;;  %v1387_v29 = vpop.f32.mrb[3].mxu0 }
 0x2a2   : > { %v1407_v31 = vmul.f32 %v1708_v24, %v1399_v18  ;;  %v1710_v33 = vadd.f32 %v1387_v29, %v981_v19  ;;  %1421 = sbr.rel (%p1699_p4) target bundleno = 689 (0x2b1), region = 60 }
 0x2a3   : > { %v1410_v34 = vadd.f32 %v1406_v26, %v1390_v23  ;;  %v1408_v41 = vmul.f32 %v1709_v28, %v1404_v30 }
 0x2a4   : > { %v1411_v36 = vadd.f32 %v1407_v31, %v1391_v27  ;;  %v1409_v40 = vmul.f32 %v1710_v33, %v1404_v30 }
 0x2a5   : > { %1414 = vst [vmem:[#allocation2] sm:$0xff] %v1410_v34  ;;  %v1412_v43 = vadd.f32 %v1408_v41, %v1392_v32 }
 0x2a6   : > { %1415 = vst [vmem:[#allocation2 + $0x8] sm:$0xff] %v1411_v36  ;;  %v1413_v37 = vadd.f32 %v1409_v40, %v1393_v35 }
 0x2a7   : > { %1416 = vst [vmem:[#allocation2 + $0x10] sm:$0xff] %v1412_v43 }
 0x2a8   : > { %1417 = vst [vmem:[#allocation2 + $0x18] sm:$0xff] %v1413_v37 }
 0x2ac   : > { %v1422_v38 = vld [vmem:[#allocation2] sm:$0xff] }
 0x2ad   : > { %v1423_v39 = vld [vmem:[#allocation2 + $0x8] sm:$0xff]  ;;  %1426 = vst [vmem:[#allocation8] sm:$0xff] %v1422_v38 }
 0x2ae   : > { %v1424_v44 = vld [vmem:[#allocation2 + $0x10] sm:$0xff]  ;;  %1427 = vst [vmem:[#allocation8 + $0x8] sm:$0xff] %v1423_v39 }
 0x2af   : > { %1428 = vst [vmem:[#allocation8 + $0x10] sm:$0xff] %v1424_v44  ;;  %v1425_v45 = vld [vmem:[#allocation2 + $0x18] sm:$0xff] }
 0x2b0   : > { %1429 = vst [vmem:[#allocation8 + $0x18] sm:$0xff] %v1425_v45 }
 0x2b1 PF: > { %p2457_p9 = scmp.eq.s32.totalorder %s1544_s24, 3  ;;  %s2129_s18 = smov [#allocation8]  }
 0x2b2   : > { %s1440_s26 = sshll.u32 %s2129_s18, 4  ;;  %s1441_s26 = int_to_ptr.vmem [resolvable:$true] %s1440_s26 }
 0x2b3   : > { %s2059_s21 = scalar_lea.vmem %s1441_s26, 512  ;;  %p2066_p13 = scmp.lt.s32.totalorder %s1441_s26, %s1441_s26 }
 0x2b4   : > { %p2060_p10 = scmp.ne.s32.totalorder %s1441_s26, %s2059_s21  ;;  %p2067_p0 = scmp.lt.s32.totalorder %s2059_s21, %s2059_s21 }
 0x2b6   : > { %p2061_p11 = pnand %p2060_p10, %p2457_p9  ;;  %p2068_p1 = por %p2067_p0, %p2066_p13 }
 0x2b8   : > { %p2062_p12 = pneg %p2061_p11 }
 0x2ba   : > { %p2069_p2 = pnand %p2068_p1, %p2062_p12 }
 0x2bc   : > { %2072 = shalt.err (!%p2069_p2)
}
 0x2bd   : > { %s2073_s24 = scalar_lea.hbm %s2498_s6, 512 }
 0x2be   : > { %p2074_p5 = scmp.ne.s32.totalorder %s2498_s6, %s2073_s24  ;;  %p2079_p3 = scmp.lt.u32.totalorder %s2073_s24, %s2498_s6 }
 0x2c0   : > { %p2075_p7 = pnand %p2074_p5, %p2457_p9 }
 0x2c2   : > { %p2076_p8 = pneg %p2075_p7 }
 0x2c4   : > { %p2081_p6 = pnand %p2079_p3, %p2076_p8 }
 0x2c6   : > { %2084 = shalt.err (!%p2081_p6)
}
 0x2c7   : > { %s2130_s10 = smov 256   ;;  %s2131_s11 = smov 16  }
 0x2c8   : > { %1724 = dma.vmem_to_hbm [thread:$0]  (%p2457_p9), %s1441_s26, 512, %s2498_s6, [#allocation5], %s2130_s10, %s2130_s10, %s2131_s11  }
 0x2c9   : > { %2106 = dma.done.wait (%p2457_p9), [#allocation5], 512  }
 0x2ca   : > { %2108 = vsyncadd (%p2457_p9), [#allocation5], 4294966784 }
 0x2cb PF: > { %s19_s23 = sadd.s32 1, %s2119_s23   ;;  %s2508_s21 = smov %s2115_s22 }
 0x2cc   : > { %p16_p4 = scmp.ge.s32.totalorder %s19_s23, 6   ;;  %s2509_s22 = smov %s2511_s25 }
 0x2ce   :  { %18 = sbr.rel (!%p16_p4) target bundleno = 4 (0x4), region = 96 }
 0x2d5   :  { %1456 = vsyncpa [#allocation4], 1 }
 0x2d6   :  { %1458 = vsyncpa [#allocation4 + $0x1], 1 }
 0x2d7   :  { %1459 = vsyncpa [#allocation7], 1 }
 0x2d8   :  { %1460 = vsyncpa [#allocation5], 1 }
 0x2d9   :  { %1462 = vsyncpa [#allocation5 + $0x1], 1 }

</bundles_post_ra>
